<compile_context>
chip_gen: v7x
topology: tpu7x:2x2x1
jax: 0.10.0
libtpu: 0.0.40
codegen_flags: <defaults>
</compile_context>

<pallas_src>
import numpy as np
import jax
import jax.numpy as jnp
from jax.experimental import pallas as pl
from jax.experimental.pallas import tpu as pltpu

PRED_PAD = 128      # lane-dense prediction slab width (real output width = 1)
LN_EPS = 1e-5       # torch nn.LayerNorm default eps
NEG_INF = -1e30


def _round_up(x, m):
    return ((x + m - 1) // m) * m


def _layer_norm(x, gamma, beta):
    mu = jnp.mean(x, axis=-1, keepdims=True)
    var = jnp.mean(jnp.square(x - mu), axis=-1, keepdims=True)
    return (x - mu) * jax.lax.rsqrt(var + LN_EPS) * gamma + beta


def spatial_dependency_kernel(
    e_sub_ref,                               # SMEM (1,) int32: number of real edges
    s_agg_ref, emb_ref,                      # aggregation mixing matrix, node embeddings
    g_src_ref, g_tgt_ref,                    # (Ep, Np) bf16 one-hot edge->node gathers
    head_sel_ref, head_expand_ref,           # per-head select / expand (tiny, f32)
    wqkv_ref, bqkv_ref,                      # fused QKV projection
    gamma1_ref, beta1_ref,
    w1_ref, b1_ref, w2_ref, b2_ref,
    gamma2_ref, beta2_ref,
    wm1_ref, bm1_ref, wm2_ref, bm2_ref,
    fused_ref, pred_ref,
):
    f32 = jnp.float32
    bf16 = jnp.bfloat16
    H = fused_ref.shape[1]

    # ---- 1) neighbor aggregation: one matmul against the host-built mixing matrix.
    x = jnp.dot(s_agg_ref[...], emb_ref[...], preferred_element_type=f32)          # (Np, H)

    # ---- 2) sparse-edge transformer block.
    # fused QKV projection: one MXU op, 3H output lanes.
    qkv = jnp.dot(x, wqkv_ref[...], preferred_element_type=f32) + bqkv_ref[...]    # (Np, 3H)

    g_src = g_src_ref[...]                   # (Ep, Np) bf16, exact one-hot
    g_tgt = g_tgt_ref[...]                   # (Ep, Np) bf16, exact one-hot

    # edge gathers: q of src nodes, fused [k|v] of tgt nodes (bf16 MXU, f32 accum).
    q_e = jnp.dot(g_src, qkv[:, :H].astype(bf16), preferred_element_type=f32)      # (Ep, H)
    kv_e = jnp.dot(g_tgt, qkv[:, H:].astype(bf16), preferred_element_type=f32)     # (Ep, 2H)
    k_e, v_e = kv_e[:, :H], kv_e[:, H:]

    # per-head scores, heads on sublanes / edges on lanes (lane-dense softmax layout).
    # head_sel already carries the 1/sqrt(head_dim) scale.
    scores = jax.lax.dot_general(
        head_sel_ref[...], q_e * k_e,
        dimension_numbers=(((0,), (1,)), ((), ())),
        preferred_element_type=f32)                                                # (NHp, Ep)
    edge_ids = jax.lax.broadcasted_iota(jnp.int32, scores.shape, 1)
    scores = jnp.where(edge_ids < e_sub_ref[0], scores, NEG_INF)   # mask padded edges

    # softmax over the edge (lane) axis  (torch: F.softmax(scores_head, dim=0))
    m = jnp.max(scores, axis=1, keepdims=True)
    p = jnp.exp(scores - m)
    probs = p * pl.reciprocal(jnp.sum(p, axis=1, keepdims=True), approx=True)      # (NHp, Ep)

    # scatter-add softmax mass onto src nodes: contract over the edge axis of g_src.
    node_mass = jax.lax.dot_general(
        g_src, probs.astype(bf16),
        dimension_numbers=(((0,), (1,)), ((), ())),
        preferred_element_type=f32)                                                # (Np, NHp)
    # Exact algebraic rewrite of gather->multiply->scatter:
    #   attn = (node_mass expanded to H) * (per-src-node sum of v_e)
    node_w = jnp.dot(node_mass, head_expand_ref[...], preferred_element_type=f32)  # (Np, H)
    v_agg = jax.lax.dot_general(
        g_src, v_e.astype(bf16),
        dimension_numbers=(((0,), (0,)), ((), ())),
        preferred_element_type=f32)                                                # (Np, H)
    attn = node_w * v_agg
    # dropout: identity in eval mode.

    x1 = _layer_norm(x + attn, gamma1_ref[...], beta1_ref[...])
    ff = jnp.maximum(jnp.dot(x1, w1_ref[...], preferred_element_type=f32) + b1_ref[...], 0.0)
    ff = jnp.dot(ff, w2_ref[...], preferred_element_type=f32) + b2_ref[...]
    x2 = _layer_norm(x1 + ff, gamma2_ref[...], beta2_ref[...])
    fused_ref[...] = x2

    # ---- 3) MLP head; Wm2/bm2 zero-padded to 128 output lanes -> lane-dense store.
    mh = jnp.maximum(jnp.dot(x2, wm1_ref[...], preferred_element_type=f32) + bm1_ref[...], 0.0)
    pred_ref[...] = jnp.dot(mh, wm2_ref[...], preferred_element_type=f32) + bm2_ref[...]


def spatial_dependency_forward(operands, n_pad, hidden_size):
    """Single fused pallas_call: aggregation + sparse attention + FFN/LN + MLP head."""
    in_specs = [pl.BlockSpec(memory_space=pltpu.MemorySpace.SMEM)]         # e_sub scalar
    in_specs += [pl.BlockSpec(memory_space=pltpu.MemorySpace.VMEM) for _ in operands[1:]]
    return pl.pallas_call(
        spatial_dependency_kernel,
        out_shape=(
            jax.ShapeDtypeStruct((n_pad, hidden_size), jnp.float32),       # fused node reps
            jax.ShapeDtypeStruct((n_pad, PRED_PAD), jnp.float32),          # lane-padded pred
        ),
        in_specs=in_specs,
        out_specs=(
            pl.BlockSpec(memory_space=pltpu.MemorySpace.VMEM),
            pl.BlockSpec(memory_space=pltpu.MemorySpace.VMEM),
        ),
        # No vmem_limit_bytes clamp: operands are checked on the host to fit well under
        # the scoped default (32 MiB) / v7x physical budget; nothing to override here.
    )(*operands)


def build_graph_operands(adj_np, index_obtains, num_heads, hidden_size):
    """Host-side (static graph) preprocessing into dense matmul operands."""
    num_nodes = adj_np.shape[0]
    head_dim = hidden_size // num_heads

    valid, agg_rows = [], []
    for vi in index_obtains:
        nbrs = np.where(adj_np[vi] > 0)[0]
        if nbrs.size == 0:
            continue                       # torch: nodes without neighbors are skipped
        deg = float(nbrs.size)
        row = np.zeros((num_nodes,), np.float32)
        row[vi] += 1.0                                         # emb[vi] term of inter_agg
        row[nbrs] += (adj_np[vi, nbrs] - 1.0) / deg            # (w_j - 1)/deg
        agg_rows.append(row)
        valid.append(int(vi))
    # TODO(synk): the torch fallback when NO queried node has neighbors (MLP-only path,
    # no transformer) is not lowered here; this script assumes >=1 valid node.
    assert valid, "example graph must yield at least one valid node"

    n_valid = len(valid)
    n_pad = _round_up(n_valid, 8)
    nn_pad = _round_up(num_nodes, 8)
    s_agg = np.zeros((n_pad, nn_pad), np.float32)
    s_agg[:n_valid, :num_nodes] = np.stack(agg_rows)

    # edges of the full graph restricted to the valid node set
    src_all, tgt_all = np.nonzero(adj_np)
    idx_map = {v: i for i, v in enumerate(valid)}
    src_m, tgt_m = [], []
    for s, t in zip(src_all, tgt_all):
        if int(s) in idx_map and int(t) in idx_map:
            src_m.append(idx_map[int(s)])
            tgt_m.append(idx_map[int(t)])
    e_sub = len(src_m)
    e_pad = max(_round_up(e_sub, 128), 128)   # lane-dense edge axis for the softmax layout
    nh_pad = _round_up(num_heads, 8)

    g_src = np.zeros((e_pad, n_pad), np.float32)
    g_tgt = np.zeros((e_pad, n_pad), np.float32)
    for e, (s, t) in enumerate(zip(src_m, tgt_m)):
        g_src[e, s] = 1.0
        g_tgt[e, t] = 1.0
    # padded-edge mask is built in-kernel from iota vs e_sub (no edge_bias operand).

    head_sel = np.zeros((hidden_size, nh_pad), np.float32)      # (H, NHp) incl. 1/sqrt(hd)
    head_expand = np.zeros((nh_pad, hidden_size), np.float32)   # (NHp, H)
    for h in range(num_heads):
        head_sel[h * head_dim:(h + 1) * head_dim, h] = 1.0 / np.sqrt(head_dim)
        head_expand[h, h * head_dim:(h + 1) * head_dim] = 1.0

    return dict(valid=valid, n_valid=n_valid, n_pad=n_pad, nn_pad=nn_pad,
                e_sub=e_sub, e_pad=e_pad,
                s_agg=s_agg, g_src=g_src, g_tgt=g_tgt,
                head_sel=head_sel, head_expand=head_expand)


if __name__ == "__main__":
    # ---- small deterministic example ----
    num_nodes = 16
    hidden_size = 32          # must be divisible by num_heads
    num_heads = 4
    mlp_hidden = 32
    index_obtains = [0, 1, 2, 4, 5, 7, 9, 10, 12, 14]

    key = jax.random.PRNGKey(0)
    ks = jax.random.split(key, 16)

    adj_raw = jax.random.uniform(ks[0], (num_nodes, num_nodes), jnp.float32)
    adj_np = np.asarray(jnp.where(adj_raw > 0.55, adj_raw, 0.0), np.float32)
    emb = np.asarray(jax.random.normal(ks[1], (num_nodes, hidden_size), jnp.float32))

    def linear(k, din, dout):
        bound = 1.0 / np.sqrt(din)
        kw, kb = jax.random.split(k)
        w = np.asarray(jax.random.uniform(kw, (din, dout), jnp.float32, -bound, bound))
        b = np.asarray(jax.random.uniform(kb, (1, dout), jnp.float32, -bound, bound))
        return w, b

    # weights stored transposed vs torch: (in, out)
    wq, bq = linear(ks[2], hidden_size, hidden_size)
    wk, bk = linear(ks[3], hidden_size, hidden_size)
    wv, bv = linear(ks[4], hidden_size, hidden_size)
    w1, b1 = linear(ks[5], hidden_size, 4 * hidden_size)
    w2, b2 = linear(ks[6], 4 * hidden_size, hidden_size)
    wm1, bm1 = linear(ks[7], hidden_size, mlp_hidden)
    wm2, bm2 = linear(ks[8], mlp_hidden, 1)
    gamma1 = np.ones((1, hidden_size), np.float32); beta1 = np.zeros((1, hidden_size), np.float32)
    gamma2 = np.ones((1, hidden_size), np.float32); beta2 = np.zeros((1, hidden_size), np.float32)

    g = build_graph_operands(adj_np, index_obtains, num_heads, hidden_size)

    emb_pad = np.zeros((g["nn_pad"], hidden_size), np.float32)
    emb_pad[:num_nodes] = emb
    wqkv = np.concatenate([wq, wk, wv], axis=1)        # (H, 3H)  fused QKV
    bqkv = np.concatenate([bq, bk, bv], axis=1)        # (1, 3H)
    wm2_pad = np.zeros((mlp_hidden, PRED_PAD), np.float32); wm2_pad[:, :1] = wm2
    bm2_pad = np.zeros((1, PRED_PAD), np.float32);          bm2_pad[:, :1] = bm2

    e_sub_arr = np.asarray([g["e_sub"]], np.int32)

    operands = [
        jnp.asarray(e_sub_arr),
        jnp.asarray(g["s_agg"]), jnp.asarray(emb_pad),
        jnp.asarray(g["g_src"], jnp.bfloat16), jnp.asarray(g["g_tgt"], jnp.bfloat16),
        jnp.asarray(g["head_sel"]), jnp.asarray(g["head_expand"]),
        jnp.asarray(wqkv), jnp.asarray(bqkv),
        jnp.asarray(gamma1), jnp.asarray(beta1),
        jnp.asarray(w1), jnp.asarray(b1), jnp.asarray(w2), jnp.asarray(b2),
        jnp.asarray(gamma2), jnp.asarray(beta2),
        jnp.asarray(wm1), jnp.asarray(bm1), jnp.asarray(wm2_pad), jnp.asarray(bm2_pad),
    ]

    # VMEM budget sanity check (v7x: 64 MiB physical, 32 MiB scoped default; keep <48 MiB).
    resident_bytes = sum(int(np.prod(o.shape)) * o.dtype.itemsize for o in operands)
    resident_bytes += (g["n_pad"] * hidden_size + g["n_pad"] * PRED_PAD) * 4
    assert resident_bytes < 48 * 1024 * 1024, "operands exceed conservative VMEM plan"

    fused_pad, pred_pad = spatial_dependency_forward(operands, g["n_pad"], hidden_size)
    fused_pad = jax.block_until_ready(fused_pad)
    pred_pad = jax.block_until_ready(pred_pad)

    n_valid = g["n_valid"]
    fused = np.asarray(fused_pad)[:n_valid]             # (N_valid, H)
    prediction = np.asarray(pred_pad)[:n_valid, :1]     # (N_valid, 1)
    result = (prediction, fused[None], None, g["valid"])   # torch-style return tuple

    # ---- pure numpy reference of the exact torch math ----
    def reference():
        agg, valid = [], []
        for vi in index_obtains:
            nbrs = np.where(adj_np[vi] > 0)[0]
            if nbrs.size == 0:
                continue
            w = adj_np[vi, nbrs].reshape(-1, 1)
            intra = np.mean(w * emb[nbrs], axis=0)
            inter = np.mean(emb[vi][None, :] - emb[nbrs], axis=0)
            agg.append(intra + inter)
            valid.append(int(vi))
        x = np.stack(agg).astype(np.float32)
        N = x.shape[0]
        head_dim = hidden_size // num_heads
        src_all, tgt_all = np.nonzero(adj_np)
        idx_map = {v: i for i, v in enumerate(valid)}
        src_m, tgt_m = [], []
        for s, t in zip(src_all, tgt_all):
            if int(s) in idx_map and int(t) in idx_map:
                src_m.append(idx_map[int(s)]); tgt_m.append(idx_map[int(t)])
        src_m = np.asarray(src_m, np.int64); tgt_m = np.asarray(tgt_m, np.int64)
        q = x @ wq + bq; k = x @ wk + bk; v = x @ wv + bv
        qh = q.reshape(N, num_heads, head_dim)
        kh = k.reshape(N, num_heads, head_dim)
        vh = v.reshape(N, num_heads, head_dim)
        out = np.zeros((N, num_heads, head_dim), np.float32)
        if src_m.size > 0:
            qe, ke, ve = qh[src_m], kh[tgt_m], vh[tgt_m]
            scores = (qe * ke).sum(-1) / np.sqrt(head_dim)
            attn_w = np.zeros_like(scores)
            for h in range(num_heads):
                sh = scores[:, h]
                sm = np.exp(sh - sh.max()); sm = sm / sm.sum()
                mass = np.zeros((N,), np.float32)
                np.add.at(mass, src_m, sm)
                attn_w[:, h] = mass[src_m]
            for h in range(num_heads):
                np.add.at(out[:, h, :], src_m, attn_w[:, h:h + 1] * ve[:, h, :])
        out = out.reshape(N, hidden_size)

        def ln(z, gmm, bta):
            mu = z.mean(-1, keepdims=True)
            var = ((z - mu) ** 2).mean(-1, keepdims=True)
            return (z - mu) / np.sqrt(var + LN_EPS) * gmm + bta

        x1 = ln(x + out, gamma1, beta1)
        ff = np.maximum(x1 @ w1 + b1, 0.0) @ w2 + b2
        x2 = ln(x1 + ff, gamma2, beta2)
        mh = np.maximum(x2 @ wm1 + bm1, 0.0)
        pred = mh @ wm2 + bm2
        return pred.astype(np.float32), x2.astype(np.float32), valid

    ref_pred, ref_fused, ref_valid = reference()
    assert g["valid"] == ref_valid
    # bf16 gather/scatter path (one-hots exact, activations bf16-rounded ~2^-9/hop) plus
    # the approximate EUP reciprocal: 1e-2 leaves comfortable headroom vs the f32 reference.
    np.testing.assert_allclose(prediction, ref_pred, rtol=1e-2, atol=1e-2)
    np.testing.assert_allclose(fused, ref_fused, rtol=1e-2, atol=1e-2)

    print("KERNEL_OK")
</pallas_src>

<mosaic_0001>
module attributes {stable_mosaic.version = 11 : i64} {
  func.func @spatial_dependency_kernel(%arg0: memref<1xi32, #tpu.memory_space<smem>>, %arg1: memref<16x16xf32, #tpu.memory_space<vmem>>, %arg2: memref<16x32xf32, #tpu.memory_space<vmem>>, %arg3: memref<128x16xbf16, #tpu.memory_space<vmem>>, %arg4: memref<128x16xbf16, #tpu.memory_space<vmem>>, %arg5: memref<32x8xf32, #tpu.memory_space<vmem>>, %arg6: memref<8x32xf32, #tpu.memory_space<vmem>>, %arg7: memref<32x96xf32, #tpu.memory_space<vmem>>, %arg8: memref<1x96xf32, #tpu.memory_space<vmem>>, %arg9: memref<1x32xf32, #tpu.memory_space<vmem>>, %arg10: memref<1x32xf32, #tpu.memory_space<vmem>>, %arg11: memref<32x128xf32, #tpu.memory_space<vmem>>, %arg12: memref<1x128xf32, #tpu.memory_space<vmem>>, %arg13: memref<128x32xf32, #tpu.memory_space<vmem>>, %arg14: memref<1x32xf32, #tpu.memory_space<vmem>>, %arg15: memref<1x32xf32, #tpu.memory_space<vmem>>, %arg16: memref<1x32xf32, #tpu.memory_space<vmem>>, %arg17: memref<32x32xf32, #tpu.memory_space<vmem>>, %arg18: memref<1x32xf32, #tpu.memory_space<vmem>>, %arg19: memref<32x128xf32, #tpu.memory_space<vmem>>, %arg20: memref<1x128xf32, #tpu.memory_space<vmem>>, %arg21: memref<16x32xf32, #tpu.memory_space<vmem>>, %arg22: memref<16x128xf32, #tpu.memory_space<vmem>>) attributes {dimension_semantics = [], scalar_prefetch = 0 : i64, scratch_operands = 0 : i64, tpu.core_type = #tpu.core_type<tc>} {
    %c0 = arith.constant 0 : index
    %c0_0 = arith.constant 0 : index
    %0 = vector.load %arg1[%c0, %c0_0] : memref<16x16xf32, #tpu.memory_space<vmem>>, vector<16x16xf32>
    %c0_1 = arith.constant 0 : index
    %c0_2 = arith.constant 0 : index
    %1 = vector.load %arg2[%c0_1, %c0_2] : memref<16x32xf32, #tpu.memory_space<vmem>>, vector<16x32xf32>
    %cst = arith.constant dense<0.000000e+00> : vector<16x32xf32>
    %2 = tpu.matmul %0, %1, %cst {dimension_numbers = #tpu.dot_dimension_numbers<[1], [0], [0], [1], [0, 0, 1, 1], [], []>} : vector<16x16xf32>, vector<16x32xf32>, vector<16x32xf32> -> vector<16x32xf32>
    %c0_3 = arith.constant 0 : index
    %c0_4 = arith.constant 0 : index
    %3 = vector.load %arg7[%c0_3, %c0_4] : memref<32x96xf32, #tpu.memory_space<vmem>>, vector<32x96xf32>
    %cst_5 = arith.constant dense<0.000000e+00> : vector<16x96xf32>
    %4 = tpu.matmul %2, %3, %cst_5 {dimension_numbers = #tpu.dot_dimension_numbers<[1], [0], [0], [1], [0, 0, 1, 1], [], []>} : vector<16x32xf32>, vector<32x96xf32>, vector<16x96xf32> -> vector<16x96xf32>
    %c0_6 = arith.constant 0 : index
    %c0_7 = arith.constant 0 : index
    %5 = vector.load %arg8[%c0_6, %c0_7] : memref<1x96xf32, #tpu.memory_space<vmem>>, vector<1x96xf32>
    %6 = vector.broadcast %5 : vector<1x96xf32> to vector<16x96xf32>
    %7 = arith.addf %4, %6 : vector<16x96xf32>
    %c0_8 = arith.constant 0 : index
    %c0_9 = arith.constant 0 : index
    %8 = vector.load %arg3[%c0_8, %c0_9] : memref<128x16xbf16, #tpu.memory_space<vmem>>, vector<128x16xbf16>
    %c0_10 = arith.constant 0 : index
    %c0_11 = arith.constant 0 : index
    %9 = vector.load %arg4[%c0_10, %c0_11] : memref<128x16xbf16, #tpu.memory_space<vmem>>, vector<128x16xbf16>
    %10 = vector.extract_strided_slice %7 {offsets = [0, 0], sizes = [16, 32], strides = [1, 1]} : vector<16x96xf32> to vector<16x32xf32>
    %11 = arith.truncf %10 : vector<16x32xf32> to vector<16x32xbf16>
    %cst_12 = arith.constant dense<0.000000e+00> : vector<128x32xf32>
    %12 = tpu.matmul %8, %11, %cst_12 {dimension_numbers = #tpu.dot_dimension_numbers<[1], [0], [0], [1], [0, 0, 1, 1], [], []>} : vector<128x16xbf16>, vector<16x32xbf16>, vector<128x32xf32> -> vector<128x32xf32>
    %13 = vector.extract_strided_slice %7 {offsets = [0, 32], sizes = [16, 64], strides = [1, 1]} : vector<16x96xf32> to vector<16x64xf32>
    %14 = arith.truncf %13 : vector<16x64xf32> to vector<16x64xbf16>
    %cst_13 = arith.constant dense<0.000000e+00> : vector<128x64xf32>
    %15 = tpu.matmul %9, %14, %cst_13 {dimension_numbers = #tpu.dot_dimension_numbers<[1], [0], [0], [1], [0, 0, 1, 1], [], []>} : vector<128x16xbf16>, vector<16x64xbf16>, vector<128x64xf32> -> vector<128x64xf32>
    %16 = vector.extract_strided_slice %15 {offsets = [0, 0], sizes = [128, 32], strides = [1, 1]} : vector<128x64xf32> to vector<128x32xf32>
    %17 = vector.extract_strided_slice %15 {offsets = [0, 32], sizes = [128, 32], strides = [1, 1]} : vector<128x64xf32> to vector<128x32xf32>
    %c0_14 = arith.constant 0 : index
    %c0_15 = arith.constant 0 : index
    %18 = vector.load %arg5[%c0_14, %c0_15] : memref<32x8xf32, #tpu.memory_space<vmem>>, vector<32x8xf32>
    %19 = arith.mulf %12, %16 : vector<128x32xf32>
    %cst_16 = arith.constant dense<0.000000e+00> : vector<8x128xf32>
    %20 = tpu.matmul %18, %19, %cst_16 {dimension_numbers = #tpu.dot_dimension_numbers<[0], [1], [1], [0], [0, 1, 1, 0], [], []>} : vector<32x8xf32>, vector<128x32xf32>, vector<8x128xf32> -> vector<8x128xf32>
    %21 = tpu.iota {dimensions = array<i32: 1>} : vector<8x128xi32>
    %c0_17 = arith.constant 0 : index
    %22 = memref.load %arg0[%c0_17] : memref<1xi32, #tpu.memory_space<smem>>
    %23 = vector.broadcast %22 : i32 to vector<8x128xi32>
    %24 = arith.cmpi slt, %21, %23 : vector<8x128xi32>
    %cst_18 = arith.constant -1.000000e+30 : f32
    %25 = vector.broadcast %cst_18 : f32 to vector<8x128xf32>
    %26 = arith.select %24, %20, %25 : vector<8x128xi1>, vector<8x128xf32>
    %cst_19 = arith.constant dense<0xFF800000> : vector<8xf32>
    %27 = vector.multi_reduction <maximumf>, %26, %cst_19 [1] : vector<8x128xf32> to vector<8xf32>
    %28 = vector.shape_cast %27 : vector<8xf32> to vector<8x1xf32>
    %29 = vector.broadcast %28 : vector<8x1xf32> to vector<8x128xf32>
    %30 = arith.subf %26, %29 : vector<8x128xf32>
    %31 = math.exp %30 : vector<8x128xf32>
    %cst_20 = arith.constant dense<0.000000e+00> : vector<8xf32>
    %32 = vector.multi_reduction <add>, %31, %cst_20 [1] : vector<8x128xf32> to vector<8xf32>
    %33 = vector.shape_cast %32 : vector<8xf32> to vector<8x1xf32>
    %34 = tpu.reciprocal %33 {approx = true} : vector<8x1xf32> -> vector<8x1xf32>
    %35 = vector.broadcast %34 : vector<8x1xf32> to vector<8x128xf32>
    %36 = arith.mulf %31, %35 : vector<8x128xf32>
    %37 = arith.truncf %36 : vector<8x128xf32> to vector<8x128xbf16>
    %cst_21 = arith.constant dense<0.000000e+00> : vector<16x8xf32>
    %38 = tpu.matmul %8, %37, %cst_21 {dimension_numbers = #tpu.dot_dimension_numbers<[0], [1], [1], [0], [0, 1, 1, 0], [], []>} : vector<128x16xbf16>, vector<8x128xbf16>, vector<16x8xf32> -> vector<16x8xf32>
    %c0_22 = arith.constant 0 : index
    %c0_23 = arith.constant 0 : index
    %39 = vector.load %arg6[%c0_22, %c0_23] : memref<8x32xf32, #tpu.memory_space<vmem>>, vector<8x32xf32>
    %cst_24 = arith.constant dense<0.000000e+00> : vector<16x32xf32>
    %40 = tpu.matmul %38, %39, %cst_24 {dimension_numbers = #tpu.dot_dimension_numbers<[1], [0], [0], [1], [0, 0, 1, 1], [], []>} : vector<16x8xf32>, vector<8x32xf32>, vector<16x32xf32> -> vector<16x32xf32>
    %41 = arith.truncf %17 : vector<128x32xf32> to vector<128x32xbf16>
    %cst_25 = arith.constant dense<0.000000e+00> : vector<16x32xf32>
    %42 = tpu.matmul %8, %41, %cst_25 {dimension_numbers = #tpu.dot_dimension_numbers<[0], [0], [1], [1], [0, 1, 1, 1], [], []>} : vector<128x16xbf16>, vector<128x32xbf16>, vector<16x32xf32> -> vector<16x32xf32>
    %43 = arith.mulf %40, %42 : vector<16x32xf32>
    %44 = arith.addf %2, %43 : vector<16x32xf32>
    %c0_26 = arith.constant 0 : index
    %c0_27 = arith.constant 0 : index
    %45 = vector.load %arg9[%c0_26, %c0_27] : memref<1x32xf32, #tpu.memory_space<vmem>>, vector<1x32xf32>
    %c0_28 = arith.constant 0 : index
    %c0_29 = arith.constant 0 : index
    %46 = vector.load %arg10[%c0_28, %c0_29] : memref<1x32xf32, #tpu.memory_space<vmem>>, vector<1x32xf32>
    %cst_30 = arith.constant dense<0.000000e+00> : vector<16xf32>
    %47 = vector.multi_reduction <add>, %44, %cst_30 [1] : vector<16x32xf32> to vector<16xf32>
    %48 = vector.shape_cast %47 : vector<16xf32> to vector<16x1xf32>
    %cst_31 = arith.constant 3.200000e+01 : f32
    %49 = vector.broadcast %cst_31 : f32 to vector<16x1xf32>
    %50 = arith.divf %48, %49 : vector<16x1xf32>
    %51 = vector.broadcast %50 : vector<16x1xf32> to vector<16x32xf32>
    %52 = arith.subf %44, %51 : vector<16x32xf32>
    %53 = arith.mulf %52, %52 : vector<16x32xf32>
    %cst_32 = arith.constant dense<0.000000e+00> : vector<16xf32>
    %54 = vector.multi_reduction <add>, %53, %cst_32 [1] : vector<16x32xf32> to vector<16xf32>
    %55 = vector.shape_cast %54 : vector<16xf32> to vector<16x1xf32>
    %cst_33 = arith.constant 3.200000e+01 : f32
    %56 = vector.broadcast %cst_33 : f32 to vector<16x1xf32>
    %57 = arith.divf %55, %56 : vector<16x1xf32>
    %58 = vector.broadcast %50 : vector<16x1xf32> to vector<16x32xf32>
    %59 = arith.subf %44, %58 : vector<16x32xf32>
    %cst_34 = arith.constant 9.99999974E-6 : f32
    %60 = vector.broadcast %cst_34 : f32 to vector<16x1xf32>
    %61 = arith.addf %57, %60 : vector<16x1xf32>
    %62 = math.rsqrt %61 : vector<16x1xf32>
    %63 = vector.broadcast %62 : vector<16x1xf32> to vector<16x32xf32>
    %64 = arith.mulf %59, %63 : vector<16x32xf32>
    %65 = vector.broadcast %45 : vector<1x32xf32> to vector<16x32xf32>
    %66 = arith.mulf %64, %65 : vector<16x32xf32>
    %67 = vector.broadcast %46 : vector<1x32xf32> to vector<16x32xf32>
    %68 = arith.addf %66, %67 : vector<16x32xf32>
    %c0_35 = arith.constant 0 : index
    %c0_36 = arith.constant 0 : index
    %69 = vector.load %arg11[%c0_35, %c0_36] : memref<32x128xf32, #tpu.memory_space<vmem>>, vector<32x128xf32>
    %cst_37 = arith.constant dense<0.000000e+00> : vector<16x128xf32>
    %70 = tpu.matmul %68, %69, %cst_37 {dimension_numbers = #tpu.dot_dimension_numbers<[1], [0], [0], [1], [0, 0, 1, 1], [], []>} : vector<16x32xf32>, vector<32x128xf32>, vector<16x128xf32> -> vector<16x128xf32>
    %c0_38 = arith.constant 0 : index
    %c0_39 = arith.constant 0 : index
    %71 = vector.load %arg12[%c0_38, %c0_39] : memref<1x128xf32, #tpu.memory_space<vmem>>, vector<1x128xf32>
    %72 = vector.broadcast %71 : vector<1x128xf32> to vector<16x128xf32>
    %73 = arith.addf %70, %72 : vector<16x128xf32>
    %cst_40 = arith.constant 0.000000e+00 : f32
    %74 = vector.broadcast %cst_40 : f32 to vector<16x128xf32>
    %75 = arith.maximumf %73, %74 : vector<16x128xf32>
    %c0_41 = arith.constant 0 : index
    %c0_42 = arith.constant 0 : index
    %76 = vector.load %arg13[%c0_41, %c0_42] : memref<128x32xf32, #tpu.memory_space<vmem>>, vector<128x32xf32>
    %cst_43 = arith.constant dense<0.000000e+00> : vector<16x32xf32>
    %77 = tpu.matmul %75, %76, %cst_43 {dimension_numbers = #tpu.dot_dimension_numbers<[1], [0], [0], [1], [0, 0, 1, 1], [], []>} : vector<16x128xf32>, vector<128x32xf32>, vector<16x32xf32> -> vector<16x32xf32>
    %c0_44 = arith.constant 0 : index
    %c0_45 = arith.constant 0 : index
    %78 = vector.load %arg14[%c0_44, %c0_45] : memref<1x32xf32, #tpu.memory_space<vmem>>, vector<1x32xf32>
    %79 = vector.broadcast %78 : vector<1x32xf32> to vector<16x32xf32>
    %80 = arith.addf %77, %79 : vector<16x32xf32>
    %81 = arith.addf %68, %80 : vector<16x32xf32>
    %c0_46 = arith.constant 0 : index
    %c0_47 = arith.constant 0 : index
    %82 = vector.load %arg15[%c0_46, %c0_47] : memref<1x32xf32, #tpu.memory_space<vmem>>, vector<1x32xf32>
    %c0_48 = arith.constant 0 : index
    %c0_49 = arith.constant 0 : index
    %83 = vector.load %arg16[%c0_48, %c0_49] : memref<1x32xf32, #tpu.memory_space<vmem>>, vector<1x32xf32>
    %cst_50 = arith.constant dense<0.000000e+00> : vector<16xf32>
    %84 = vector.multi_reduction <add>, %81, %cst_50 [1] : vector<16x32xf32> to vector<16xf32>
    %85 = vector.shape_cast %84 : vector<16xf32> to vector<16x1xf32>
    %cst_51 = arith.constant 3.200000e+01 : f32
    %86 = vector.broadcast %cst_51 : f32 to vector<16x1xf32>
    %87 = arith.divf %85, %86 : vector<16x1xf32>
    %88 = vector.broadcast %87 : vector<16x1xf32> to vector<16x32xf32>
    %89 = arith.subf %81, %88 : vector<16x32xf32>
    %90 = arith.mulf %89, %89 : vector<16x32xf32>
    %cst_52 = arith.constant dense<0.000000e+00> : vector<16xf32>
    %91 = vector.multi_reduction <add>, %90, %cst_52 [1] : vector<16x32xf32> to vector<16xf32>
    %92 = vector.shape_cast %91 : vector<16xf32> to vector<16x1xf32>
    %cst_53 = arith.constant 3.200000e+01 : f32
    %93 = vector.broadcast %cst_53 : f32 to vector<16x1xf32>
    %94 = arith.divf %92, %93 : vector<16x1xf32>
    %95 = vector.broadcast %87 : vector<16x1xf32> to vector<16x32xf32>
    %96 = arith.subf %81, %95 : vector<16x32xf32>
    %cst_54 = arith.constant 9.99999974E-6 : f32
    %97 = vector.broadcast %cst_54 : f32 to vector<16x1xf32>
    %98 = arith.addf %94, %97 : vector<16x1xf32>
    %99 = math.rsqrt %98 : vector<16x1xf32>
    %100 = vector.broadcast %99 : vector<16x1xf32> to vector<16x32xf32>
    %101 = arith.mulf %96, %100 : vector<16x32xf32>
    %102 = vector.broadcast %82 : vector<1x32xf32> to vector<16x32xf32>
    %103 = arith.mulf %101, %102 : vector<16x32xf32>
    %104 = vector.broadcast %83 : vector<1x32xf32> to vector<16x32xf32>
    %105 = arith.addf %103, %104 : vector<16x32xf32>
    %c0_55 = arith.constant 0 : index
    %c0_56 = arith.constant 0 : index
    %106 = vector.load %arg21[%c0_55, %c0_56] : memref<16x32xf32, #tpu.memory_space<vmem>>, vector<16x32xf32>
    tpu.vector_store %arg21[%c0_55, %c0_56], %105 {strides = array<i32>} : memref<16x32xf32, #tpu.memory_space<vmem>>, vector<16x32xf32>,
    %c0_57 = arith.constant 0 : index
    %c0_58 = arith.constant 0 : index
    %107 = vector.load %arg17[%c0_57, %c0_58] : memref<32x32xf32, #tpu.memory_space<vmem>>, vector<32x32xf32>
    %cst_59 = arith.constant dense<0.000000e+00> : vector<16x32xf32>
    %108 = tpu.matmul %105, %107, %cst_59 {dimension_numbers = #tpu.dot_dimension_numbers<[1], [0], [0], [1], [0, 0, 1, 1], [], []>} : vector<16x32xf32>, vector<32x32xf32>, vector<16x32xf32> -> vector<16x32xf32>
    %c0_60 = arith.constant 0 : index
    %c0_61 = arith.constant 0 : index
    %109 = vector.load %arg18[%c0_60, %c0_61] : memref<1x32xf32, #tpu.memory_space<vmem>>, vector<1x32xf32>
    %110 = vector.broadcast %109 : vector<1x32xf32> to vector<16x32xf32>
    %111 = arith.addf %108, %110 : vector<16x32xf32>
    %cst_62 = arith.constant 0.000000e+00 : f32
    %112 = vector.broadcast %cst_62 : f32 to vector<16x32xf32>
    %113 = arith.maximumf %111, %112 : vector<16x32xf32>
    %c0_63 = arith.constant 0 : index
    %c0_64 = arith.constant 0 : index
    %114 = vector.load %arg19[%c0_63, %c0_64] : memref<32x128xf32, #tpu.memory_space<vmem>>, vector<32x128xf32>
    %cst_65 = arith.constant dense<0.000000e+00> : vector<16x128xf32>
    %115 = tpu.matmul %113, %114, %cst_65 {dimension_numbers = #tpu.dot_dimension_numbers<[1], [0], [0], [1], [0, 0, 1, 1], [], []>} : vector<16x32xf32>, vector<32x128xf32>, vector<16x128xf32> -> vector<16x128xf32>
    %c0_66 = arith.constant 0 : index
    %c0_67 = arith.constant 0 : index
    %116 = vector.load %arg20[%c0_66, %c0_67] : memref<1x128xf32, #tpu.memory_space<vmem>>, vector<1x128xf32>
    %117 = vector.broadcast %116 : vector<1x128xf32> to vector<16x128xf32>
    %118 = arith.addf %115, %117 : vector<16x128xf32>
    %c0_68 = arith.constant 0 : index
    %c0_69 = arith.constant 0 : index
    %119 = vector.load %arg22[%c0_68, %c0_69] : memref<16x128xf32, #tpu.memory_space<vmem>>, vector<16x128xf32>
    tpu.vector_store %arg22[%c0_68, %c0_69], %118 {strides = array<i32>} : memref<16x128xf32, #tpu.memory_space<vmem>>, vector<16x128xf32>,
    return
  }
}

</mosaic_0001>

<bundles_post_ra>
// kernel: tpu_custom_call.1
= control target key start
LH: loop header
LB: loop body
LE: loop exit
PB: predicated region body
PF: predicated region fallthrough
CT: control target
= control target key end

     0   :  { %s2577_s0 = inlined_call_operand.<no memory space> [shape: s32[1], index: 0, kind: input, shape index: {}]   ;;  %s2578_s1 = inlined_call_operand.vmem [shape: f32[16,16], index: 1, kind: input, shape index: {}]   ;;  %s2579_s2 = inlined_call_operand.vmem [shape: f32[16,32], index: 2, kind: input, shape index: {}]   ;;  %s2580_s3 = inlined_call_operand.vmem [shape: bf16[128,16], index: 3, kind: input, shape index: {}]   ;;  %s2581_s4 = inlined_call_operand.vmem [shape: bf16[128,16], index: 4, kind: input, shape index: {}]   ;;  %s2582_s5 = inlined_call_operand.vmem [shape: f32[32,8], index: 5, kind: input, shape index: {}]   ;;  %s2583_s6 = inlined_call_operand.vmem [shape: f32[8,32], index: 6, kind: input, shape index: {}]   ;;  %s2584_s7 = inlined_call_operand.vmem [shape: f32[32,96], index: 7, kind: input, shape index: {}]   ;;  %s2585_s8 = inlined_call_operand.vmem [shape: f32[1,96], index: 8, kind: input, shape index: {}]   ;;  %s2586_s9 = inlined_call_operand.vmem [shape: f32[1,32], index: 9, kind: input, shape index: {}]   ;;  %s2587_s10 = inlined_call_operand.vmem [shape: f32[1,32], index: 10, kind: input, shape index: {}]   ;;  %s2588_s11 = inlined_call_operand.vmem [shape: f32[32,128], index: 11, kind: input, shape index: {}]   ;;  %s2589_s12 = inlined_call_operand.vmem [shape: f32[1,128], index: 12, kind: input, shape index: {}]   ;;  %s2590_s13 = inlined_call_operand.vmem [shape: f32[128,32], index: 13, kind: input, shape index: {}]   ;;  %s2591_s14 = inlined_call_operand.vmem [shape: f32[1,32], index: 14, kind: input, shape index: {}]   ;;  %s2592_s15 = inlined_call_operand.vmem [shape: f32[1,32], index: 15, kind: input, shape index: {}]   ;;  %s2593_s16 = inlined_call_operand.vmem [shape: f32[1,32], index: 16, kind: input, shape index: {}]   ;;  %s2594_s17 = inlined_call_operand.vmem [shape: f32[32,32], index: 17, kind: input, shape index: {}]   ;;  %s2595_s18 = inlined_call_operand.vmem [shape: f32[1,32], index: 18, kind: input, shape index: {}]   ;;  %s2596_s19 = inlined_call_operand.vmem [shape: f32[32,128], index: 19, kind: input, shape index: {}]   ;;  %s2597_s20 = inlined_call_operand.vmem [shape: f32[1,128], index: 20, kind: input, shape index: {}]   ;;  %s2598_s21 = inlined_call_operand.hbm [shape: f32[16,32], index: 21, kind: output, shape index: {0}]   ;;  %s2599_s22 = inlined_call_operand.hbm [shape: f32[16,128], index: 22, kind: output, shape index: {1}]  }
   0x1   :  { %2605 = sst [smem:[#allocation9_spill]] %s2577_s0 }
   0x2   :  { %2606 = sst [smem:[#allocation10_spill]] %s2578_s1 }
   0x3   :  { %2607 = sst [smem:[#allocation11_spill]] %s2579_s2 }
   0x4   :  { %2608 = sst [smem:[#allocation12_spill]] %s2580_s3 }
   0x5   :  { %2609 = sst [smem:[#allocation13_spill]] %s2581_s4 }
   0x6   :  { %2610 = sst [smem:[#allocation14_spill]] %s2582_s5 }
   0x7   :  { %2611 = sst [smem:[#allocation15_spill]] %s2583_s6 }
   0x8   :  { %29 = vsyncpa [#allocation4], 0  ;;  %s2612_s29 = sld [smem:[#allocation11_spill]]  ;;  %s2613_s1 = sld [smem:[#allocation10_spill]]  ;;  %vm78_vm0 = vcmask 130048   ;;  %v160_v4 = vld [vmem:[%s2584_s7] sm:$0xff] }
   0x9   :  { %v161_v5 = vld [vmem:[%s2584_s7 + $0x8] sm:$0xff]  ;;  %v162_v8 = vld [vmem:[%s2584_s7 + $0x10] sm:$0xff]  ;;  %v163_v9 = vld [vmem:[%s2584_s7 + $0x18] sm:$0xff] }
   0xa   :  { %v1896_v7 = vpack.c.bf16 %v161_v5, %v160_v4  ;;  %v1900_v10 = vpack.c.bf16 %v163_v9, %v162_v8 }
   0xe   :  { %v76_v0 = vld [vmem:[%s2612_s29] sm:$0xff]  ;;  %v77_v1 = vld [vmem:[%s2612_s29 + $0x8] sm:$0xff] }
   0xf   :  { %v74_v2 = vld [vmem:[%s2613_s1] sm:$0xff]  ;;  %v1892_v3 = vpack.c.bf16 %v77_v1, %v76_v0  ;;  %v75_v6 = vld [vmem:[%s2613_s1 + $0x8] sm:$0xff] }
  0x10   :  { %1708 = vmatprep.mubr.msk.f32.mxu1 %vm78_vm0, %v74_v2 }
  0x11   :  { %1893 = vmatprep.subr.bf16.mxu1 %v1892_v3 }
  0x12   :  { %1895 = vmatpush3.bf16.msra.mxu1 %v1892_v3 }
  0x13   :  { %1897 = vmatprep.subr.bf16.mxu1 %v1896_v7 }
  0x15   :  { %1709 = vmatmul.mubr.msk.f32.vlgmr.msra.gmra.mrb[0].mxu1 %vm78_vm0, %v75_v6 }
  0x16   :  { %1899 = vmatpush3.bf16.msra.mxu1 %v1896_v7 }
  0x17   :  { %1901 = vmatprep.subr.bf16.mxu1 %v1900_v10 }
  0x1a   :  { %1903 = vmatpush3.bf16.msra.mxu1 %v1900_v10 }
  0x1b   :  { %30 = vsyncpa [#allocation6], 0  ;;  %vm171_vm1 = vcmask 261120   ;;  %s2614_s4 = sld [smem:[#allocation12_spill]]  ;;  %s2615_s1 = sld [smem:[#allocation13_spill]]  ;;  %v2077_v40 = vmov 0.0|0.0  }
  0x1c   :  { %v1541_v15 = vld [vmem:[%s2585_s8] ss:$0 sm:$0xff]  ;;  %s2076_s6 = smov 96   ;;  %s2616_s2 = sld [smem:[#allocation14_spill]]  ;;  %vm2078_vm2 = vmmov 0   ;;  %v2079_v57 = vmov 0.0   ;;  %vm2353_vm3 = vmpackc.low %vm171_vm1, %vm171_vm1 }
  0x1d   :  { %s2619_s7 = sld [smem:[#allocation9_spill]]  ;;  %s2620_s23 = sld [smem:[#allocation15_spill]]  ;;  %vm867_vm5 = vcmask 64512  }
  0x1e   :  { %s2080_s26 = smov [#allocation3]  }
  0x21   :  { %v2236_v13 = vld [vmem:[%s2614_s4] sm:$0xff]   ;;  %v2251_v21 = vld [vmem:[%s2614_s4 + $0x8] sm:$0xff]   ;;  %v2256_v22 = vld [vmem:[%s2614_s4 + $0x10] sm:$0xff]  }
  0x22   :  { %1724 = vmatprep.mubr.msk.bf16.mxu0 %vm78_vm0, %v2236_v13  ;;  %v2002_v14 = vld [vmem:[%s2615_s1] sm:$0xff]   ;;  %v2265_v23 = vld [vmem:[%s2614_s4 + $0x18] sm:$0xff]   ;;  %v2279_v25 = vld [vmem:[%s2614_s4 + $0x28] sm:$0xff]  }
  0x23   :  { %v2270_v24 = vld [vmem:[%s2614_s4 + $0x20] sm:$0xff]   ;;  %v2284_v26 = vld [vmem:[%s2614_s4 + $0x30] sm:$0xff]   ;;  %v2293_v27 = vld [vmem:[%s2614_s4 + $0x38] sm:$0xff]  }
  0x24   :  { %v612_v28 = vld [vmem:[%s2616_s2] sm:$0xff]  ;;  %v613_v29 = vld [vmem:[%s2616_s2 + $0x8] sm:$0xff]  ;;  %v614_v30 = vld [vmem:[%s2616_s2 + $0x10] sm:$0xff] }
  0x25   :  { %v615_v31 = vld [vmem:[%s2616_s2 + $0x18] sm:$0xff]  ;;  %v2003_v33 = vld [vmem:[%s2615_s1 + $0x8] sm:$0xff]   ;;  %v2005_v34 = vld [vmem:[%s2615_s1 + $0x10] sm:$0xff]   ;;  %s1512_s2 = sshll.u32 %s2080_s26, 4  ;;  %s1513_s2 = int_to_ptr.vmem [resolvable:$true] %s1512_s2 }
  0x26   :  { %v2007_v35 = vld [vmem:[%s2615_s1 + $0x18] sm:$0xff]   ;;  %v2009_v36 = vld [vmem:[%s2615_s1 + $0x20] sm:$0xff]   ;;  %v2011_v37 = vld [vmem:[%s2615_s1 + $0x28] sm:$0xff]   ;;  %p2033_p1 = scmp.lt.s32.totalorder %s1513_s2, %s1513_s2 }
  0x27   :  { %v2013_v38 = vld [vmem:[%s2615_s1 + $0x30] sm:$0xff]   ;;  %v2015_v39 = vld [vmem:[%s2615_s1 + $0x38] sm:$0xff]  }
  0xe8   :  { %v2225_v11 = vpop.f32.mrb[0].mxu1 }
  0xe9   :  { %v2227_v12 = vpop.f32.mrb[1].mxu1 }
  0xea   :  { %1719 = vmatprep.mubr.msk.f32.mxu1 %vm171_vm1, %v2227_v12 }
  0xeb   :  { %1720 = vmatmul.mubr.msk.f32.vlgmr.msra.gmra.mrb[2].mxu1 %vm171_vm1, %v2225_v11 }
  0xec   :  { %1742 = vmatprep.mubr.msk.bf16.mxu1 %vm78_vm0, %v2002_v14 }
 0x1be   :  { %v1721_v16 = vpop.f32.mrb[2].mxu1 }
 0x1bf   :  { %v250_v17 = vadd.f32 %v1721_v16, %v1541_v15  ;;  %v244_v18 = vpop.f32.mrb[3].mxu1 }
 0x1c0   :  { %v245_v19 = vadd.f32 %v1541_v15, %v244_v18 }
 0x1c2   :  { %v285_v20 = vpack.c.bf16 %v250_v17, %v245_v19 }
 0x1c4   :  { %488 = vrot.lane.b32.xlu0 %v285_v20, %s2076_s6  ;;  %1722 = vmatprep.subr.bf16.mxu0 %v285_v20 }
 0x1c5   :  { %1723 = vmatpush3.bf16.msra.mxu0 %v285_v20 }
 0x1c6   :  { %1904 = vmatprep.subr.bf16.mxu0 %v2077_v40 }
 0x1c8   :  { %1725 = vmatmul.mubr.msk.bf16.vlgmr.msra.gmra.mrb[0].mxu0 %vm78_vm0, %v2251_v21 }
 0x1c9   :  { %1728 = vmatprep.mubr.msk.bf16.mxu0 %vm78_vm0, %v2256_v22 }
 0x1d0   :  { %1729 = vmatmul.mubr.msk.bf16.gmra.mrb[4].mxu0 %vm78_vm0, %v2265_v23 }
 0x1d1   :  { %1732 = vmatprep.mubr.msk.bf16.mxu0 %vm78_vm0, %v2270_v24 }
 0x1d8   :  { %1733 = vmatmul.mubr.msk.bf16.gmra.mrb[8].mxu0 %vm78_vm0, %v2279_v25 }
 0x1d9   :  { %1736 = vmatprep.mubr.msk.bf16.mxu0 %vm78_vm0, %v2284_v26 }
 0x1e0   :  { %1737 = vmatmul.mubr.msk.bf16.gmra.mrb[12].mxu0 %vm78_vm0, %v2293_v27 }
 0x1e1   :  { %1790 = vmatprep.mubr.msk.f32.mxu0 %vm2078_vm2, %v2079_v57 }
 0x1e2   :  { %632 = vxpose.xlu0.b32.start [1/4] (short) (narrow) %v612_v28, 8 }
 0x1e6   :  { %633 = vxpose.xlu0.b32.cont [2/4] (short) (narrow) %v613_v29, 8 }
 0x1ea   :  { %634 = vxpose.xlu0.b32.cont [3/4] (short) (narrow) %v614_v30, 8 }
 0x1ee   :  { %635 = vxpose.xlu0.b32.end [4/4] (short) (narrow) %v615_v31, 8 }
 0x236   :  { %v489_v32 = vpop.permute.xlu0 %488 }
 0x237   :  { %1740 = vmatprep.subr.bf16.mxu1 %v489_v32 }
 0x238   :  { %1741 = vmatpush3.bf16.msra.mxu1 %v489_v32 }
 0x239   :  { %1793 = vmatprep.subr.bf16.mxu1 %v2079_v57 }
 0x23b   :  { %1743 = vmatmul.mubr.msk.bf16.vlgmr.msra.gmra.mrb[4].mxu1 %vm78_vm0, %v2003_v33 }
 0x23c   :  { %1746 = vmatprep.mubr.msk.bf16.mxu1 %vm78_vm0, %v2005_v34 }
 0x243   :  { %1747 = vmatmul.mubr.msk.bf16.gmra.mrb[8].mxu1 %vm78_vm0, %v2007_v35 }
 0x244   :  { %1750 = vmatprep.mubr.msk.bf16.mxu1 %vm78_vm0, %v2009_v36 }
 0x24b   :  { %1751 = vmatmul.mubr.msk.bf16.gmra.mrb[12].mxu1 %vm78_vm0, %v2011_v37 }
 0x24c   :  { %1754 = vmatprep.mubr.msk.bf16.mxu1 %vm78_vm0, %v2013_v38 }
 0x253   :  { %1755 = vmatmul.mubr.msk.bf16.gmra.mrb[16].mxu1 %vm78_vm0, %v2015_v39 }
 0x254   :  { %1795 = vmatprep.mubr.msk.bf16.mxu1 %vm2078_vm2, %v2079_v57 }
 0x29b   :  { %v1726_v41 = vpop.f32.mrb[0].mxu0 }
 0x29c   :  { %v384_v42 = vpop.f32.mrb[1].mxu0 }
 0x29d   :  { %v1727_v43 = vpop.f32.mrb[2].mxu0 }
 0x29e   :  { %v387_v44 = vpop.f32.mrb[3].mxu0 }
 0x2a3   :  { %v1730_v45 = vpop.f32.mrb[4].mxu0 }
 0x2a4   :  { %v400_v46 = vpop.f32.mrb[5].mxu0 }
 0x2a5   :  { %v1731_v47 = vpop.f32.mrb[6].mxu0 }
 0x2a6   :  { %v403_v48 = vpop.f32.mrb[7].mxu0 }
 0x2ab   :  { %v1734_v49 = vpop.f32.mrb[8].mxu0 }
 0x2ac   :  { %v416_v50 = vpop.f32.mrb[9].mxu0 }
 0x2ad   :  { %v1735_v51 = vpop.f32.mrb[10].mxu0 }
 0x2ae   :  { %v419_v52 = vpop.f32.mrb[11].mxu0 }
 0x2b3   :  { %v1738_v53 = vpop.f32.mrb[12].mxu0 }
 0x2b4   :  { %v432_v54 = vpop.f32.mrb[13].mxu0 }
 0x2b5   :  { %v1739_v55 = vpop.f32.mrb[14].mxu0 }
 0x2b6   :  { %v435_v56 = vpop.f32.mrb[15].mxu0 }
 0x30e   :  { %v2343_v58 = vpop.f32.mrb[4].mxu1 }
 0x30f   :  { %v618_v59 = vmul.f32 %v2343_v58, %v1726_v41  ;;  %v549_v60 = vpop.f32.mrb[5].mxu1 }
 0x310   :  { %v616_v61 = vmul.f32 %v549_v60, %v384_v42  ;;  %v2346_v62 = vpop.f32.mrb[6].mxu1 }
 0x311   :  { %v619_v63 = vmul.f32 %v2346_v62, %v1727_v43  ;;  %v950_v0 = vpack.c.bf16 %v2346_v62, %v2343_v58  ;;  %v552_v1 = vpop.f32.mrb[7].mxu1 }
 0x312   :  { %v617_v2 = vmul.f32 %v552_v1, %v387_v44  ;;  %v949_v3 = vpack.c.bf16 %v552_v1, %v549_v60 }
 0x313   :  { %v1909_v4 = vpack.c.bf16 %v619_v63, %v618_v59 }
 0x314   :  { %v1905_v6 = vpack.c.bf16 %v617_v2, %v616_v61  ;;  %965 = vrot.lane.b32.xlu0 %v949_v3, %s2076_s6 }
 0x316   :  { %1907 = vmatpush3.bf16.xpose.msk.msra.mxu0 %vm2353_vm3, %v1905_v6  ;;  %v1748_v7 = vpop.f32.mrb[8].mxu1 }
 0x317   :  { %v622_v8 = vmul.f32 %v1748_v7, %v1730_v45  ;;  %v2360_v9 = vpop.f32.mrb[9].mxu1  ;;  %1908 = vmatprep.subr.bf16.mxu0 %v2077_v40 }
 0x318   :  { %v620_v10 = vmul.f32 %v2360_v9, %v400_v46  ;;  %v1749_v14 = vpop.f32.mrb[10].mxu1 }
 0x319   :  { %v623_v15 = vmul.f32 %v1749_v14, %v1731_v47  ;;  %v952_v16 = vpack.c.bf16 %v1749_v14, %v1748_v7  ;;  %v2364_v17 = vpop.f32.mrb[11].mxu1 }
 0x31a   :  { %v621_v18 = vmul.f32 %v2364_v17, %v403_v48  ;;  %v951_v19 = vpack.c.bf16 %v2364_v17, %v2360_v9 }
 0x31b   :  { %v1917_v20 = vpack.c.bf16 %v623_v15, %v622_v8  ;;  %971 = vrot.lane.b32.xlu0 %v952_v16, %s2076_s6 }
 0x31c   :  { %v1913_v28 = vpack.c.bf16 %v621_v18, %v620_v10 }
 0x31e   :  { %1911 = vmatpush3.bf16.xpose.msk.msra.mxu0 %vm2353_vm3, %v1909_v4  ;;  %v1752_v29 = vpop.f32.mrb[12].mxu1 }
 0x31f   :  { %1912 = vmatprep.subr.bf16.mxu0 %v2077_v40  ;;  %v626_v30 = vmul.f32 %v1752_v29, %v1734_v49  ;;  %v581_v31 = vpop.f32.mrb[13].mxu1 }
 0x320   :  { %v624_v32 = vmul.f32 %v581_v31, %v416_v50  ;;  %v1753_v33 = vpop.f32.mrb[14].mxu1 }
 0x321   :  { %v627_v34 = vmul.f32 %v1753_v33, %v1735_v51  ;;  %v954_v35 = vpack.c.bf16 %v1753_v33, %v1752_v29  ;;  %v584_v36 = vpop.f32.mrb[15].mxu1 }
 0x322   :  { %v625_v37 = vmul.f32 %v584_v36, %v419_v52  ;;  %v953_v38 = vpack.c.bf16 %v584_v36, %v581_v31 }
 0x323   :  { %v1925_v39 = vpack.c.bf16 %v627_v34, %v626_v30  ;;  %975 = vrot.lane.b32.xlu0 %v954_v35, %s2076_s6 }
 0x324   :  { %v1921_v41 = vpack.c.bf16 %v625_v37, %v624_v32 }
 0x326   :  { %1915 = vmatpush3.bf16.xpose.msk.msra.mxu0 %vm2353_vm3, %v1913_v28  ;;  %v1756_v42 = vpop.f32.mrb[16].mxu1 }
 0x327   :  { %1916 = vmatprep.subr.bf16.mxu0 %v2077_v40  ;;  %v630_v43 = vmul.f32 %v1756_v42, %v1738_v53  ;;  %v597_v44 = vpop.f32.mrb[17].mxu1  ;;  %v648_v53 = vpop.trf.xlu0 }
 0x328   :  { %v628_v45 = vmul.f32 %v597_v44, %v432_v54  ;;  %v1757_v46 = vpop.f32.mrb[18].mxu1  ;;  %v785_v54 = vlaneseq }
 0x329   :  { %v631_v47 = vmul.f32 %v1757_v46, %v1739_v55  ;;  %v956_v48 = vpack.c.bf16 %v1757_v46, %v1756_v42  ;;  %v600_v49 = vpop.f32.mrb[19].mxu1  ;;  %v1080_v42 = vld [vmem:[%s2588_s11 + $0x8] sm:$0xff] }
 0x32a   :  { %v629_v50 = vmul.f32 %v600_v49, %v435_v56  ;;  %v955_v51 = vpack.c.bf16 %v600_v49, %v597_v44  ;;  %v786_v55 = vand.u32 127, %v785_v54  ;;  %v788_v56 = vstv %s2619_s7  ;;  %v1081_v44 = vld [vmem:[%s2588_s11 + $0x10] sm:$0xff] }
 0x32b   :  { %v1933_v52 = vpack.c.bf16 %v631_v47, %v630_v43  ;;  %979 = vrot.lane.b32.xlu0 %v956_v48, %s2076_s6  ;;  %v1173_v47 = vld [vmem:[%s2590_s13] sm:$0xff]  ;;  %v1174_v48 = vld [vmem:[%s2590_s13 + $0x8] sm:$0xff] }
 0x32c   :  { %v1929_v59 = vpack.c.bf16 %v629_v50, %v628_v45  ;;  %vm789_vm4 = vcmp.lt.s32.totalorder %v786_v55, %v788_v56  ;;  %v1082_v45 = vld [vmem:[%s2588_s11 + $0x18] sm:$0xff]  ;;  %v1944_v49 = vpack.c.bf16 %v1174_v48, %v1173_v47  ;;  %v1595_v56 = vld [vmem:[%s2586_s9] ss:$0 sm:$0xff] }
 0x32d   :  { %v1940_v46 = vpack.c.bf16 %v1082_v45, %v1081_v44 }
 0x32e   :  { %1919 = vmatpush3.bf16.xpose.msk.msra.mxu0 %vm2353_vm3, %v1917_v20 }
 0x32f   :  { %1920 = vmatprep.subr.bf16.mxu0 %v2077_v40 }
 0x336   :  { %1923 = vmatpush3.bf16.xpose.msk.msra.mxu0 %vm2353_vm3, %v1921_v41 }
 0x337   :  { %1924 = vmatprep.subr.bf16.mxu0 %v2077_v40 }
 0x33e   :  { %1927 = vmatpush3.bf16.xpose.msk.msra.mxu0 %vm2353_vm3, %v1925_v39 }
 0x33f   :  { %1928 = vmatprep.subr.bf16.mxu0 %v2077_v40 }
 0x346   :  { %1931 = vmatpush3.bf16.xpose.msk.msra.mxu0 %vm2353_vm3, %v1929_v59 }
 0x347   :  { %1932 = vmatprep.subr.bf16.mxu0 %v2077_v40 }
 0x34e   :  { %1935 = vmatpush3.bf16.xpose.msk.msra.mxu0 %vm2353_vm3, %v1933_v52 }
 0x355   :  { %1791 = vmatmul.mubr.msk.f32.vlgmr.msra.gmra.mrb[16].mxu0 %vm171_vm1, %v648_v53 }
 0x386   :  { %v966_v62 = vpop.permute.xlu0 %965 }
 0x38d   :  { %v972_v6 = vpop.permute.xlu0 %971 }
 0x395   :  { %v976_v8 = vpop.permute.xlu0 %975 }
 0x39d   :  { %v980_v10 = vpop.permute.xlu0 %979 }
 0x428   :  { %v781_v60 = vpop.f32.mrb[16].mxu0 }
 0x429   :  { %v1792_v61 = vpop.f32.mrb[17].mxu0  ;;  %v790_v63 = vsel %vm789_vm4, %v781_v60, -1e+30 }
 0x42a   :  { %791 = vmax.xlane.f32.xlu1 %v790_v63 }
 0x4b7   :  { %v792_v1 = vpop.xlane.xlu1 %791 }
 0x4b8   :  { %v793_v2 = vsub.f32 %v790_v63, %v792_v1  ;;  %v1596_v63 = vld [vmem:[%s2587_s10] ss:$0 sm:$0xff] }
 0x4ba   :  { %v794_v40 = vmul.f32 1.442695, %v793_v2 }
 0x4bc   :  { %2016 = vpow2.f32 %v794_v40  ;;  %v1175_v40 = vld [vmem:[%s2590_s13 + $0x10] sm:$0xff] }
 0x4c6   :  { %v2017_v3 = vpop.eup %2016 }
 0x4c7   :  { %796 = vadd.xlane.f32.xlu1 %v2017_v3 }
 0x4f4   :  { %809 = vxpose.xlu1.c.b16.start [1/8] (narrow) %v2236_v13, 16 }
 0x4f8   :  { %810 = vxpose.xlu1.c.b16.cont [2/8] (narrow) %v2251_v21, 16 }
 0x4fc   :  { %811 = vxpose.xlu1.c.b16.cont [3/8] (narrow) %v2256_v22, 16 }
 0x500   :  { %812 = vxpose.xlu1.c.b16.cont [4/8] (narrow) %v2265_v23, 16 }
 0x504   :  { %813 = vxpose.xlu1.c.b16.cont [5/8] (narrow) %v2270_v24, 16 }
 0x508   :  { %814 = vxpose.xlu1.c.b16.cont [6/8] (narrow) %v2279_v25, 16  ;;  %v866_v25 = vld [vmem:[%s2620_s23] sm:$0xff] }
 0x50c   :  { %815 = vxpose.xlu1.c.b16.cont [7/8] (narrow) %v2284_v26, 16 }
 0x510   :  { %816 = vxpose.xlu1.c.b16.end [8/8] (narrow) %v2293_v27, 16 }
 0x514   :  { %967 = vrot.lane.b32.xlu1 %v950_v0, %s2076_s6 }
 0x518   :  { %969 = vrot.lane.b32.xlu1 %v951_v19, %s2076_s6 }
 0x51c   :  { %973 = vrot.lane.b32.xlu1 %v953_v38, %s2076_s6 }
 0x520   :  { %977 = vrot.lane.b32.xlu1 %v955_v51, %s2076_s6 }
 0x554   :  { %v797_v13 = vpop.xlane.xlu1 %796 }
 0x555   :  { %2018 = vrcp.f32 %v797_v13 }
 0x55a   :  { %v817_v24 = vpop.trf.xlu1 }
 0x55f   :  { %v2019_v21 = vpop.eup %2018 }
 0x560   :  { %v799_v22 = vmul.f32 %v2019_v21, %v2017_v3  ;;  %v1176_v3 = vld [vmem:[%s2590_s13 + $0x18] sm:$0xff] }
 0x562   :  { %v800_v23 = vpack.c.bf16 %v799_v22, %v799_v22 }
 0x564   :  { %1794 = vmatpush3.bf16.xpose.msra.mxu1 %v800_v23  ;;  %v1948_v23 = vpack.c.bf16 %v1176_v3, %v1175_v40 }
 0x565   :  { %1799 = vmatprep.subr.mxu1 %v866_v25 }
 0x56b   :  { %1796 = vmatmul.mubr.bf16.vlgmr.msra.gmra.mrb[20].mxu1 %v817_v24 }
 0x56c   :  { %1800 = vmatpush3.msra.mxu1 %v866_v25  ;;  %v1178_v25 = vld [vmem:[%s2590_s13 + $0x28] sm:$0xff] }
 0x56d   :  { %1804 = vmatprep.subr.bf16.mxu1 %v2079_v57 }
 0x586   :  { %v968_v4 = vpop.permute.xlu1 %967 }
 0x58a   :  { %v970_v5 = vpop.permute.xlu1 %969 }
 0x58e   :  { %v974_v7 = vpop.permute.xlu1 %973 }
 0x592   :  { %v978_v9 = vpop.permute.xlu1 %977 }
 0x63e   :  { %v859_v26 = vpop.f32.mrb[20].mxu1 }
 0x63f   :  { %v1797_v27 = vpop.f32.mrb[21].mxu1  ;;  %1801 = vmatprep.mubr.msk.f32.mxu1 %vm867_vm5, %v859_v26 }
 0x640   :  { %v862_v58 = vpop.f32.mrb[22].mxu1  ;;  %v1179_v27 = vld [vmem:[%s2590_s13 + $0x30] sm:$0xff] }
 0x641   :  { %1802 = vmatmul.mubr.msk.f32.vlgmr.msra.gmra.mrb[24].mxu1 %vm867_vm5, %v862_v58  ;;  %v1798_v0 = vpop.f32.mrb[23].mxu1  ;;  %v1180_v58 = vld [vmem:[%s2590_s13 + $0x38] sm:$0xff] }
 0x642   :  { %1805 = vmatpush3.bf16.msra.mxu1 %v966_v62  ;;  %1820 = vmatprep.mubr.msk.bf16.mxu1 %vm2078_vm2, %v2079_v57  ;;  %v1956_v62 = vpack.c.bf16 %v1180_v58, %v1179_v27  ;;  %v1181_v0 = vld [vmem:[%s2590_s13 + $0x40] sm:$0xff] }
 0x643   :  { %1806 = vmatprep.subr.bf16.mxu1 %v2079_v57 }
 0x646   :  { %1807 = vmatpush3.bf16.msra.mxu1 %v968_v4  ;;  %v1182_v4 = vld [vmem:[%s2590_s13 + $0x48] sm:$0xff] }
 0x647   :  { %1808 = vmatprep.subr.bf16.mxu1 %v2079_v57 }
 0x64a   :  { %1809 = vmatpush3.bf16.msra.mxu1 %v970_v5  ;;  %v1960_v5 = vpack.c.bf16 %v1182_v4, %v1181_v0  ;;  %v1416_v0 = vld [vmem:[%s2596_s19 + $0x18] sm:$0xff] }
 0x64b   :  { %1810 = vmatprep.subr.bf16.mxu1 %v2079_v57 }
 0x64e   :  { %1811 = vmatpush3.bf16.msra.mxu1 %v972_v6  ;;  %v1183_v6 = vld [vmem:[%s2590_s13 + $0x50] sm:$0xff] }
 0x64f   :  { %1812 = vmatprep.subr.bf16.mxu1 %v2079_v57 }
 0x652   :  { %1813 = vmatpush3.bf16.msra.mxu1 %v974_v7  ;;  %v1184_v7 = vld [vmem:[%s2590_s13 + $0x58] sm:$0xff] }
 0x653   :  { %1814 = vmatprep.subr.bf16.mxu1 %v2079_v57 }
 0x656   :  { %1815 = vmatpush3.bf16.msra.mxu1 %v976_v8  ;;  %v1964_v8 = vpack.c.bf16 %v1184_v7, %v1183_v6 }
 0x657   :  { %1816 = vmatprep.subr.bf16.mxu1 %v2079_v57 }
 0x65a   :  { %1817 = vmatpush3.bf16.msra.mxu1 %v978_v9  ;;  %v1185_v9 = vld [vmem:[%s2590_s13 + $0x60] sm:$0xff] }
 0x65b   :  { %1818 = vmatprep.subr.bf16.mxu1 %v2079_v57 }
 0x65e   :  { %1819 = vmatpush3.bf16.msra.mxu1 %v980_v10  ;;  %v1186_v10 = vld [vmem:[%s2590_s13 + $0x68] sm:$0xff] }
 0x661   :  { %1821 = vmatmul.mubr.bf16.vlgmr.msra.gmra.mrb[28].mxu1 %v817_v24  ;;  %v1177_v24 = vld [vmem:[%s2590_s13 + $0x20] sm:$0xff] }
 0x662   :  { %v1952_v26 = vpack.c.bf16 %v1178_v25, %v1177_v24 }
 0x714   :  { %v1803_v14 = vpop.f32.mrb[24].mxu1 }
 0x715   :  { %v940_v15 = vpop.f32.mrb[25].mxu1 }
 0x734   :  { %v1023_v16 = vpop.f32.mrb[28].mxu1 }
 0x735   :  { %v1030_v17 = vmul.f32 %v1023_v16, %v940_v15  ;;  %v1822_v18 = vpop.f32.mrb[29].mxu1  ;;  %v1187_v15 = vld [vmem:[%s2590_s13 + $0x70] sm:$0xff]  ;;  %v1188_v16 = vld [vmem:[%s2590_s13 + $0x78] sm:$0xff] }
 0x736   :  { %v1026_v19 = vpop.f32.mrb[30].mxu1  ;;  %v1597_v18 = vld [vmem:[%s2589_s12] ss:$0 sm:$0xff] }
 0x737   :  { %v1031_v20 = vmul.f32 %v1803_v14, %v1026_v19  ;;  %v1823_v28 = vpop.f32.mrb[31].mxu1  ;;  %v1032_v29 = vadd.f32 %v1030_v17, %v2227_v12  ;;  %v1968_v14 = vpack.c.bf16 %v1186_v10, %v1185_v9  ;;  %v1972_v17 = vpack.c.bf16 %v1188_v16, %v1187_v15 }
 0x739   :  { %v1036_v30 = vsel %vm171_vm1, %v1032_v29, 0.0  ;;  %v1033_v31 = vadd.f32 %v2225_v11, %v1031_v20  ;;  %v1079_v11 = vld [vmem:[%s2588_s11] sm:$0xff] }
 0x73a   :  { %1037 = vadd.xlane.f32.xlu1 %v1036_v30  ;;  %v1936_v43 = vpack.c.bf16 %v1080_v42, %v1079_v11 }
 0x73b   :  { %v1039_v57 = vsel %vm171_vm1, %v1033_v31, 0.0 }
 0x73c   :  { %1040 = vadd.xlane.f32.xlu0 %v1039_v57  ;;  %1937 = vmatprep.subr.bf16.mxu0 %v1936_v43  ;;  %v1600_v57 = vld [vmem:[%s2591_s14] ss:$0 sm:$0xff] }
 0x73d   :  { %1939 = vmatpush3.bf16.msra.mxu0 %v1936_v43 }
 0x73e   :  { %1941 = vmatprep.subr.bf16.mxu0 %v1940_v46 }
 0x741   :  { %1943 = vmatpush3.bf16.msra.mxu0 %v1940_v46 }
 0x742   :  { %1945 = vmatprep.subr.bf16.mxu0 %v1944_v49 }
 0x7c7   :  { %v1038_v32 = vpop.xlane.xlu1 %1037 }
 0x7c8   :  { %v1043_v33 = vmul.f32 0.03125, %v1038_v32 }
 0x7c9   :  { %v1041_v34 = vpop.xlane.xlu0 %1040 }
 0x7ca   :  { %v1045_v35 = vsub.f32 %v1032_v29, %v1043_v33  ;;  %v1044_v36 = vmul.f32 0.03125, %v1041_v34 }
 0x7cc   :  { %v1046_v37 = vsub.f32 %v1033_v31, %v1044_v36  ;;  %v1047_v38 = vmul.f32 %v1045_v35, %v1045_v35 }
 0x7ce   :  { %v1049_v39 = vsel %vm171_vm1, %v1047_v38, 0.0  ;;  %v1048_v41 = vmul.f32 %v1046_v37, %v1046_v37 }
 0x7cf   :  { %1050 = vadd.xlane.f32.xlu0 %v1049_v39 }
 0x7d0   :  { %v1052_v12 = vsel %vm171_vm1, %v1048_v41, 0.0 }
 0x7d1   :  { %1053 = vadd.xlane.f32.xlu1 %v1052_v12 }
 0x85c   :  { %v1051_v50 = vpop.xlane.xlu0 %1050 }
 0x85d   :  { %v1055_v51 = vmul.f32 0.03125, %v1051_v50  ;;  %v1320_v50 = vld [vmem:[%s2594_s17 + $0x8] sm:$0xff] }
 0x85e   :  { %v1054_v52 = vpop.xlane.xlu1 %1053 }
 0x85f   :  { %v1057_v59 = vadd.f32 1e-05, %v1055_v51  ;;  %v1056_v53 = vmul.f32 0.03125, %v1054_v52  ;;  %v1321_v52 = vld [vmem:[%s2594_s17 + $0x10] sm:$0xff] }
 0x861   :  { %2020 = vrsqrt.f32 %v1057_v59  ;;  %v1058_v54 = vadd.f32 1e-05, %v1056_v53  ;;  %v1322_v59 = vld [vmem:[%s2594_s17 + $0x18] sm:$0xff] }
 0x862   :  { %v1980_v53 = vpack.c.bf16 %v1322_v59, %v1321_v52 }
 0x863   :  { %2022 = vrsqrt.f32 %v1058_v54  ;;  %v1413_v54 = vld [vmem:[%s2596_s19] sm:$0xff] }
 0x86b   :  { %v2021_v55 = vpop.eup %2020 }
 0x86c   :  { %v1061_v60 = vmul.f32 %v2021_v55, %v1045_v35  ;;  %v1414_v55 = vld [vmem:[%s2596_s19 + $0x8] sm:$0xff] }
 0x86d   :  { %v2023_v61 = vpop.eup %2022 }
 0x86e   :  { %v1062_v1 = vmul.f32 %v2023_v61, %v1046_v37  ;;  %v1069_v2 = vmul.f32 %v1595_v56, %v1061_v60 }
 0x870   :  { %v1070_v13 = vmul.f32 %v1595_v56, %v1062_v1  ;;  %v1077_v21 = vadd.f32 %v1596_v63, %v1069_v2  ;;  %v1984_v56 = vpack.c.bf16 %v1414_v55, %v1413_v54 }
 0x872   :  { %v1078_v22 = vadd.f32 %v1596_v63, %v1070_v13  ;;  %1832 = vmatprep.mubr.msk.f32.mxu0 %vm171_vm1, %v1077_v21  ;;  %v1601_v13 = vld [vmem:[%s2592_s15] ss:$0 sm:$0xff] }
 0x874   :  { %1833 = vmatmul.mubr.msk.f32.vlgmr.msra.gmra.mrb[18].mxu0 %vm171_vm1, %v1078_v22 }
 0x875   :  { %1947 = vmatpush3.bf16.msra.mxu0 %v1944_v49  ;;  %v1319_v49 = vld [vmem:[%s2594_s17] sm:$0xff] }
 0x876   :  { %1949 = vmatprep.subr.bf16.mxu0 %v1948_v23  ;;  %v1976_v51 = vpack.c.bf16 %v1320_v50, %v1319_v49 }
 0x878   :  { %1977 = vmatprep.subr.bf16.mxu1 %v1976_v51 }
 0x879   :  { %1951 = vmatpush3.bf16.msra.mxu0 %v1948_v23  ;;  %1979 = vmatpush3.bf16.msra.mxu1 %v1976_v51  ;;  %v1602_v23 = vld [vmem:[%s2593_s16] ss:$0 sm:$0xff] }
 0x87a   :  { %1953 = vmatprep.subr.bf16.mxu0 %v1952_v26  ;;  %1981 = vmatprep.subr.bf16.mxu1 %v1980_v53 }
 0x87d   :  { %1955 = vmatpush3.bf16.msra.mxu0 %v1952_v26  ;;  %1983 = vmatpush3.bf16.msra.mxu1 %v1980_v53 }
 0x87e   :  { %1957 = vmatprep.subr.bf16.mxu0 %v1956_v62  ;;  %1985 = vmatprep.subr.bf16.mxu1 %v1984_v56 }
 0x881   :  { %1959 = vmatpush3.bf16.msra.mxu0 %v1956_v62  ;;  %v1415_v62 = vld [vmem:[%s2596_s19 + $0x10] sm:$0xff]  ;;  %s2028_s19 = scalar_lea.vmem %s1513_s2, 256 }
 0x882   :  { %1961 = vmatprep.subr.bf16.mxu0 %v1960_v5  ;;  %v1988_v4 = vpack.c.bf16 %v1416_v0, %v1415_v62  ;;  %p2029_p0 = scmp.ne.s32.totalorder %s1513_s2, %s2028_s19  ;;  %p2034_p2 = scmp.lt.s32.totalorder %s2028_s19, %s2028_s19 }
 0x884   :  { %p2035_p3 = por %p2034_p2, %p2033_p1 }
 0x885   :  { %1963 = vmatpush3.bf16.msra.mxu0 %v1960_v5  ;;  %v1603_v5 = vld [vmem:[%s2595_s18] ss:$0 sm:$0xff] }
 0x886   :  { %1965 = vmatprep.subr.bf16.mxu0 %v1964_v8  ;;  %p2036_p4 = pnand %p2035_p3, %p2029_p0 }
 0x889   :  { %1967 = vmatpush3.bf16.msra.mxu0 %v1964_v8 }
 0x88a   :  { %1969 = vmatprep.subr.bf16.mxu0 %v1968_v14 }
 0x88d   :  { %1971 = vmatpush3.bf16.msra.mxu0 %v1968_v14 }
 0x88e   :  { %1973 = vmatprep.subr.bf16.mxu0 %v1972_v17 }
 0x891   :  { %1975 = vmatpush3.bf16.msra.mxu0 %v1972_v17 }
 0x947   :  { %v1834_v19 = vpop.f32.mrb[18].mxu0 }
 0x948   :  { %v1168_v20 = vadd.f32 %v1834_v19, %v1597_v18  ;;  %v1162_v28 = vpop.f32.mrb[19].mxu0 }
 0x949   :  { %v1163_v29 = vadd.f32 %v1597_v18, %v1162_v28 }
 0x94a   :  { %v1172_v31 = vmax.f32 %v1168_v20, 0.0 }
 0x94b   :  { %v1171_v30 = vmax.f32 %v1163_v29, 0.0 }
 0x94d   :  { %1867 = vmatprep.mubr.f32.mxu0 %v1171_v30 }
 0x94e   :  { %1868 = vmatmul.mubr.f32.vlgmr.msra.gmra.mrb[20].mxu0 %v1172_v31 }
 0xa21   :  { %v1869_v32 = vpop.f32.mrb[20].mxu0 }
 0xa22   :  { %v1268_v33 = vadd.f32 %v1869_v32, %v1600_v57  ;;  %v1262_v34 = vpop.f32.mrb[21].mxu0 }
 0xa23   :  { %v1263_v35 = vadd.f32 %v1600_v57, %v1262_v34 }
 0xa24   :  { %v1272_v36 = vadd.f32 %v1268_v33, %v1078_v22 }
 0xa25   :  { %v1271_v37 = vadd.f32 %v1263_v35, %v1077_v21 }
 0xa26   :  { %v1278_v38 = vsel %vm171_vm1, %v1272_v36, 0.0 }
 0xa27   :  { %1279 = vadd.xlane.f32.xlu1 %v1278_v38  ;;  %v1275_v39 = vsel %vm171_vm1, %v1271_v37, 0.0 }
 0xa28   :  { %1276 = vadd.xlane.f32.xlu0 %v1275_v39 }
 0xab4   :  { %v1280_v41 = vpop.xlane.xlu1 %1279 }
 0xab5   :  { %v1282_v12 = vmul.f32 0.03125, %v1280_v41  ;;  %v1277_v11 = vpop.xlane.xlu0 %1276 }
 0xab6   :  { %v1281_v42 = vmul.f32 0.03125, %v1277_v11 }
 0xab7   :  { %v1284_v43 = vsub.f32 %v1272_v36, %v1282_v12 }
 0xab8   :  { %v1283_v44 = vsub.f32 %v1271_v37, %v1281_v42 }
 0xab9   :  { %v1286_v45 = vmul.f32 %v1284_v43, %v1284_v43 }
 0xaba   :  { %v1285_v46 = vmul.f32 %v1283_v44, %v1283_v44 }
 0xabb   :  { %v1290_v47 = vsel %vm171_vm1, %v1286_v45, 0.0 }
 0xabc   :  { %1291 = vadd.xlane.f32.xlu1 %v1290_v47  ;;  %v1287_v48 = vsel %vm171_vm1, %v1285_v46, 0.0 }
 0xabd   :  { %1288 = vadd.xlane.f32.xlu0 %v1287_v48 }
 0xb49   :  { %v1292_v60 = vpop.xlane.xlu1 %1291 }
 0xb4a   :  { %v1294_v61 = vmul.f32 0.03125, %v1292_v60  ;;  %v1289_v63 = vpop.xlane.xlu0 %1288 }
 0xb4b   :  { %v1293_v1 = vmul.f32 0.03125, %v1289_v63 }
 0xb4c   :  { %v1296_v2 = vadd.f32 1e-05, %v1294_v61 }
 0xb4d   :  { %v1295_v40 = vadd.f32 1e-05, %v1293_v1 }
 0xb4e   :  { %2024 = vrsqrt.f32 %v1296_v2 }
 0xb4f   :  { %2026 = vrsqrt.f32 %v1295_v40 }
 0xb58   :  { %v2025_v3 = vpop.eup %2024 }
 0xb59   :  { %v2027_v21 = vpop.eup %2026  ;;  %v1300_v22 = vmul.f32 %v2025_v3, %v1284_v43 }
 0xb5a   :  { %v1299_v24 = vmul.f32 %v2027_v21, %v1283_v44 }
 0xb5b   :  { %v1308_v25 = vmul.f32 %v1601_v13, %v1300_v22 }
 0xb5c   :  { %v1307_v26 = vmul.f32 %v1601_v13, %v1299_v24 }
 0xb5d   :  { %v1316_v27 = vadd.f32 %v1602_v23, %v1308_v25 }
 0xb5e   :  { %v1315_v58 = vadd.f32 %v1602_v23, %v1307_v26 }
 0xb5f   :  { %1318 = vst.msk [vmem:[#allocation3 + $0x8] sm:$0xff] %vm171_vm1, %v1316_v27 }
 0xb60   :  { %1878 = vmatprep.mubr.msk.f32.mxu1 %vm171_vm1, %v1315_v58  ;;  %1317 = vst.msk [vmem:[#allocation3] sm:$0xff] %vm171_vm1, %v1315_v58 }
 0xb61   :  { %1879 = vmatmul.mubr.msk.f32.vlgmr.msra.gmra.mrb[26].mxu1 %vm171_vm1, %v1316_v27 }
 0xb62   :  { %1987 = vmatpush3.bf16.msra.mxu1 %v1984_v56 }
 0xb63   :  { %1989 = vmatprep.subr.bf16.mxu1 %v1988_v4 }
 0xb66   :  { %1991 = vmatpush3.bf16.msra.mxu1 %v1988_v4 }
 0xc34   :  { %v1880_v6 = vpop.f32.mrb[26].mxu1 }
 0xc35   :  { %v1408_v7 = vadd.f32 %v1880_v6, %v1603_v5  ;;  %v1402_v8 = vpop.f32.mrb[27].mxu1 }
 0xc36   :  { %v1403_v9 = vadd.f32 %v1603_v5, %v1402_v8 }
 0xc37   :  { %v1412_v14 = vmax.f32 %v1408_v7, 0.0 }
 0xc38   :  { %v1411_v10 = vmax.f32 %v1403_v9, 0.0 }
 0xc3a   :  { %1889 = vmatprep.mubr.msk.f32.mxu1 %vm171_vm1, %v1411_v10 }
 0xc3b   :  { %1890 = vmatmul.mubr.msk.f32.vlgmr.msra.gmra.mrb[32].mxu1 %vm171_vm1, %v1412_v14 }
 0xc3c   :  { %2039 = shalt.err (!%p2036_p4)
}
 0xc3d   :  { %s2040_s8 = scalar_lea.hbm %s2598_s21, 256 }
 0xc3e   :  { %p2041_p5 = scmp.ne.s32.totalorder %s2598_s21, %s2040_s8  ;;  %p2044_p6 = scmp.lt.u32.totalorder %s2040_s8, %s2598_s21 }
 0xc40   :  { %p2046_p7 = pnand %p2044_p6, %p2041_p5 }
 0xc42   :  { %2049 = shalt.err (!%p2046_p7)
}
 0xc43   :  { %s2081_s28 = smov 128   ;;  %s2082_s4 = smov 8   ;;  %v1606_v15 = vld [vmem:[%s2597_s20] ss:$0 sm:$0xff] }
 0xc44   :  { %1518 = dma.vmem_to_hbm [thread:$0]  %s1513_s2, 256, %s2598_s21, [#allocation4], %s2081_s28, %s2081_s28, %s2082_s4  }
 0xc45   :  { %s2083_s30 = smov [#allocation5]  }
 0xc46   :  { %s1524_s0 = sshll.u32 %s2083_s30, 4  ;;  %s1525_s0 = int_to_ptr.vmem [resolvable:$true] %s1524_s0 }
 0xc47   :  { %s2050_s17 = scalar_lea.vmem %s1525_s0, 256  ;;  %p2055_p9 = scmp.lt.s32.totalorder %s1525_s0, %s1525_s0 }
 0xc48   :  { %p2051_p8 = scmp.ne.s32.totalorder %s1525_s0, %s2050_s17  ;;  %p2056_p10 = scmp.lt.s32.totalorder %s2050_s17, %s2050_s17 }
 0xc4a   :  { %p2057_p11 = por %p2056_p10, %p2055_p9 }
 0xc4c   :  { %p2058_p12 = pnand %p2057_p11, %p2051_p8 }
 0xd0e   :  { %v1891_v16 = vpop.f32.mrb[32].mxu1 }
 0xd0f   :  { %v1502_v17 = vadd.f32 %v1891_v16, %v1606_v15  ;;  %v1496_v18 = vpop.f32.mrb[33].mxu1 }
 0xd10   :  { %v1497_v19 = vadd.f32 %v1606_v15, %v1496_v18 }
 0xd11   :  { %1506 = vst [vmem:[#allocation5 + $0x8] sm:$0xff] %v1502_v17 }
 0xd12   :  { %1505 = vst [vmem:[#allocation5] sm:$0xff] %v1497_v19 }
 0xd13   :  { %2061 = shalt.err (!%p2058_p12)
}
 0xd14   :  { %s2062_s20 = scalar_lea.hbm %s2599_s22, 256 }
 0xd15   :  { %p2063_p13 = scmp.ne.s32.totalorder %s2599_s22, %s2062_s20  ;;  %p2066_p0 = scmp.lt.u32.totalorder %s2062_s20, %s2599_s22 }
 0xd17   :  { %p2068_p1 = pnand %p2066_p0, %p2063_p13 }
 0xd19   :  { %2071 = shalt.err (!%p2068_p1)
}
 0xd1a   :  { %1530 = dma.vmem_to_hbm [thread:$0]  %s1525_s0, 256, %s2599_s22, [#allocation6], %s2081_s28, %s2081_s28, %s2082_s4  }
 0xd1b   :  { %2072 = dma.done.wait [#allocation4], 256  }
 0xd1c   :  { %2073 = vsyncadd [#allocation4], 4294967040 }
 0xd1d   :  { %2074 = dma.done.wait [#allocation6], 256  }
 0xd1e   :  { %2075 = vsyncadd [#allocation6], 4294967040 }
 0xd1f   :  { %1537 = vsyncpa [#allocation4], 1 }
 0xd20   :  { %1538 = vsyncpa [#allocation6], 1 }

</bundles_post_ra>
